<compile_context>
chip_gen: v5e
topology: v5e:2x2
jax: 0.10.0
libtpu: 0.0.40
codegen_flags: <defaults>
</compile_context>

<pallas_src>
import functools

import jax
import jax.numpy as jnp
from jax.experimental import pallas as pl
from jax.experimental.pallas import tpu as pltpu

LANE = 128        # lane width (last-dim tiling unit)
HID_ALIGN = 256   # fc2 contraction depth aligned to the v6e/v7x 256x256 MXU


def _round_up(n, m):
    return ((n + m - 1) // m) * m


def policy_kernel(x_ref, w1_ref, b1_ref, w2_ref, b2_ref, noise_ref, out_ref):
    # x:     (TB, IN)          w1: (IN, HID_P)     b1: (1, HID_P)
    # w2:    (HID_P, OUT_P)    b2: (1, OUT_P)      noise: (TB, OUT_P)  Exp(1)
    # out:   (TB, OUT_P) f32   cols [0:out_size] = probs,
    #                          col OUT_P-2 = action (as f32), col OUT_P-1 = log_prob
    x = x_ref[...]

    # fc1 + ReLU.  Padded hidden columns are exactly 0 after ReLU (zero W1/b1 pad).
    h = jnp.dot(x, w1_ref[...], preferred_element_type=jnp.float32)
    h = jnp.maximum(h + b1_ref[...], 0.0)

    # Output layer.  Padded logit columns carry a finite -1e30 bias.
    logits = jnp.dot(h, w2_ref[...], preferred_element_type=jnp.float32)
    logits = logits + b2_ref[...]

    # Numerically stable softmax (exact division: probs sum to 1 to f32 precision).
    m = jnp.max(logits, axis=-1, keepdims=True)
    e = jnp.exp(logits - m)                      # padded cols underflow to exactly 0
    denom = jnp.sum(e, axis=-1, keepdims=True)   # >= 1 (max column contributes 1)
    probs = e / denom

    # ---- fused categorical sampling via the exponential race ------------------
    # argmax_i e_i / E_i, E_i ~ Exp(1)  ==  Categorical(probs).sample().
    # Reuses e (no extra log); padded columns have e == 0 so they can never win.
    race = e / noise_ref[...]
    out_p = race.shape[-1]
    lane = jax.lax.broadcasted_iota(jnp.int32, race.shape, 1)
    rm = jnp.max(race, axis=-1, keepdims=True)
    action = jnp.min(jnp.where(race >= rm, lane, out_p), axis=-1, keepdims=True)

    # log_prob(action) = logits[action] - logsumexp(logits)
    onehot = lane == action
    picked = jnp.sum(jnp.where(onehot, logits, 0.0), axis=-1, keepdims=True)
    logp = picked - (m + jnp.log(denom))

    # Fold the two (TB, 1) results into spare padded lanes -> one lane-dense store.
    merged = jnp.where(lane == out_p - 2, action.astype(jnp.float32), probs)
    merged = jnp.where(lane == out_p - 1, logp, merged)
    out_ref[...] = merged


def init_policy_params(key, in_size, hidden_size, out_size):
    """PyTorch nn.Linear-style init (uniform +/- 1/sqrt(fan_in)).
    Weights stored as (in_features, out_features) = transpose of torch's (out, in)."""
    k1, k2, k3, k4 = jax.random.split(key, 4)
    bound1 = 1.0 / jnp.sqrt(in_size)
    bound2 = 1.0 / jnp.sqrt(hidden_size)
    w1 = jax.random.uniform(k1, (in_size, hidden_size), jnp.float32, -bound1, bound1)
    b1 = jax.random.uniform(k2, (1, hidden_size), jnp.float32, -bound1, bound1)
    w2 = jax.random.uniform(k3, (hidden_size, out_size), jnp.float32, -bound2, bound2)
    b2 = jax.random.uniform(k4, (1, out_size), jnp.float32, -bound2, bound2)
    return w1, b1, w2, b2


def pad_policy_params(w1, b1, w2, b2):
    """One-time wrapper-side padding: HID -> 256-aligned, OUT -> 128-aligned
    (with 2 spare lanes reserved for the fused action / log_prob columns)."""
    in_size, hid = w1.shape
    out = w2.shape[1]
    hid_p = _round_up(hid, HID_ALIGN)
    out_p = _round_up(out + 2, LANE)             # reserve 2 lanes for action / logp
    w1p = jnp.zeros((in_size, hid_p), jnp.float32).at[:, :hid].set(w1)
    b1p = jnp.zeros((1, hid_p), jnp.float32).at[:, :hid].set(b1)
    w2p = jnp.zeros((hid_p, out_p), jnp.float32).at[:hid, :out].set(w2)
    # finite large-negative pad (NOT -inf) so max-subtract never produces inf-inf=NaN
    b2p = jnp.full((1, out_p), -1e30, jnp.float32).at[:, :out].set(b2)
    return w1p, b1p, w2p, b2p


@functools.partial(jax.jit, static_argnames=("out_size",))
def policy_sample(x, padded_params, key, out_size):
    """x: (B, in_size) f32 -> (probs (B,out_size) f32, action (B,) i32, log_prob (B,) f32)."""
    w1p, b1p, w2p, b2p = padded_params
    B, in_size = x.shape
    hid_p = w1p.shape[1]
    out_p = w2p.shape[1]
    assert out_size + 2 <= out_p, "need 2 spare padded lanes for fused action/logp"

    # Batch tiling: >= 2 tiles whenever B > 8 (v7x dual-TC sharding via "parallel"),
    # capped at 1024 rows/tile to amortize per-step overhead on v5e/v6e.
    if B <= 8:
        TB = 8
    else:
        TB = min(1024, _round_up((B + 1) // 2, 8))
    B_pad = _round_up(B, TB)
    if B_pad != B:
        x = jnp.pad(x, ((0, B_pad - B), (0, 0)))

    # Exp(1) race noise (clamped away from 0 so e/E never divides by zero).
    noise = jnp.maximum(jax.random.exponential(key, (B_pad, out_p), jnp.float32), 1e-9)

    merged = pl.pallas_call(
        policy_kernel,
        out_shape=jax.ShapeDtypeStruct((B_pad, out_p), jnp.float32),
        grid_spec=pltpu.PrefetchScalarGridSpec(
            num_scalar_prefetch=0,
            grid=(B_pad // TB,),
            in_specs=[
                pl.BlockSpec((TB, in_size), lambda i: (i, 0)),    # x (row-blocked)
                pl.BlockSpec((in_size, hid_p), lambda i: (0, 0)),  # w1 (resident)
                pl.BlockSpec((1, hid_p), lambda i: (0, 0)),        # b1 (resident)
                pl.BlockSpec((hid_p, out_p), lambda i: (0, 0)),    # w2 (resident)
                pl.BlockSpec((1, out_p), lambda i: (0, 0)),        # b2 (resident)
                pl.BlockSpec((TB, out_p), lambda i: (i, 0)),       # race noise
            ],
            out_specs=pl.BlockSpec((TB, out_p), lambda i: (i, 0)),  # lane-dense merged
        ),
        compiler_params=pltpu.CompilerParams(
            dimension_semantics=("parallel",),   # shards batch tiles on v7x's 2 TCs
        ),
    )(x, w1p, b1p, w2p, b2p, noise)

    probs = merged[:B, :out_size]
    action = merged[:B, out_p - 2].astype(jnp.int32)
    logp = merged[:B, out_p - 1]
    return probs, action, logp


if __name__ == "__main__":
    # Small shapes consistent with a REINFORCE policy (CartPole-like):
    # batch=2, in_size=4, hidden_size=32, out_size=2.
    B, IN, HID, OUT = 2, 4, 32, 2

    key = jax.random.PRNGKey(0)
    kx, kp, ks = jax.random.split(key, 3)
    x = jax.random.normal(kx, (B, IN), dtype=jnp.float32)
    w1, b1, w2, b2 = init_policy_params(kp, IN, HID, OUT)
    padded = pad_policy_params(w1, b1, w2, b2)

    probs, action, logp = policy_sample(x, padded, ks, out_size=OUT)
    probs, action, logp = jax.block_until_ready((probs, action, logp))

    # Pure-JAX reference of the same forward math (unpadded).
    h_ref = jnp.maximum(x @ w1 + b1, 0.0)
    logits_ref = h_ref @ w2 + b2
    probs_ref = jax.nn.softmax(logits_ref, axis=-1)

    assert probs.shape == (B, OUT)
    assert jnp.allclose(probs, probs_ref, atol=2e-3, rtol=2e-3)
    assert jnp.allclose(jnp.sum(probs, axis=-1), 1.0, atol=1e-3)

    # Fused sampling sanity: actions in range, log_prob consistent with probs.
    assert action.shape == (B,) and logp.shape == (B,)
    assert bool(jnp.all((action >= 0) & (action < OUT)))
    logp_ref = jnp.log(probs_ref[jnp.arange(B), action])
    assert jnp.allclose(logp, logp_ref, atol=2e-3, rtol=2e-3)

    # TODO(synk): `action.item()` (host scalar transfer) and the Python-side
    # Categorical object stay outside the kernel; the sample + log_prob math is fused.
    print("KERNEL_OK")
</pallas_src>

<mosaic_0001>
module attributes {stable_mosaic.version = 11 : i64} {
  func.func @policy_kernel(%arg0: i32, %arg1: memref<8x4xf32, #tpu.memory_space<vmem>>, %arg2: memref<4x256xf32, #tpu.memory_space<vmem>>, %arg3: memref<1x256xf32, #tpu.memory_space<vmem>>, %arg4: memref<256x128xf32, #tpu.memory_space<vmem>>, %arg5: memref<1x128xf32, #tpu.memory_space<vmem>>, %arg6: memref<8x128xf32, #tpu.memory_space<vmem>>, %arg7: memref<8x128xf32, #tpu.memory_space<vmem>>) attributes {dimension_semantics = [#tpu.dimension_semantics<parallel>], iteration_bounds = array<i64: 1>, scalar_prefetch = 0 : i64, scratch_operands = 0 : i64, tpu.core_type = #tpu.core_type<tc>, window_params = [{transform_indices = @transform_0, window_bounds = array<i64: 8, 4>}, {pipeline_mode = #tpu.pipeline_mode<synchronous>, transform_indices = @transform_1, window_bounds = array<i64: 4, 256>}, {pipeline_mode = #tpu.pipeline_mode<synchronous>, transform_indices = @transform_2, window_bounds = array<i64: 1, 256>}, {pipeline_mode = #tpu.pipeline_mode<synchronous>, transform_indices = @transform_3, window_bounds = array<i64: 256, 128>}, {pipeline_mode = #tpu.pipeline_mode<synchronous>, transform_indices = @transform_4, window_bounds = array<i64: 1, 128>}, {transform_indices = @transform_5, window_bounds = array<i64: 8, 128>}, {transform_indices = @transform_6, window_bounds = array<i64: 8, 128>}]} {
    %c0 = arith.constant 0 : index
    %c0_0 = arith.constant 0 : index
    %0 = vector.load %arg1[%c0, %c0_0] : memref<8x4xf32, #tpu.memory_space<vmem>>, vector<8x4xf32>
    %c0_1 = arith.constant 0 : index
    %c0_2 = arith.constant 0 : index
    %1 = vector.load %arg2[%c0_1, %c0_2] : memref<4x256xf32, #tpu.memory_space<vmem>>, vector<4x256xf32>
    %cst = arith.constant dense<0.000000e+00> : vector<8x256xf32>
    %2 = tpu.matmul %0, %1, %cst {dimension_numbers = #tpu.dot_dimension_numbers<[1], [0], [0], [1], [0, 0, 1, 1], [], []>} : vector<8x4xf32>, vector<4x256xf32>, vector<8x256xf32> -> vector<8x256xf32>
    %c0_3 = arith.constant 0 : index
    %c0_4 = arith.constant 0 : index
    %3 = vector.load %arg3[%c0_3, %c0_4] : memref<1x256xf32, #tpu.memory_space<vmem>>, vector<1x256xf32>
    %4 = vector.broadcast %3 : vector<1x256xf32> to vector<8x256xf32>
    %5 = arith.addf %2, %4 : vector<8x256xf32>
    %cst_5 = arith.constant 0.000000e+00 : f32
    %6 = vector.broadcast %cst_5 : f32 to vector<8x256xf32>
    %7 = arith.maximumf %5, %6 : vector<8x256xf32>
    %c0_6 = arith.constant 0 : index
    %c0_7 = arith.constant 0 : index
    %8 = vector.load %arg4[%c0_6, %c0_7] : memref<256x128xf32, #tpu.memory_space<vmem>>, vector<256x128xf32>
    %cst_8 = arith.constant dense<0.000000e+00> : vector<8x128xf32>
    %9 = tpu.matmul %7, %8, %cst_8 {dimension_numbers = #tpu.dot_dimension_numbers<[1], [0], [0], [1], [0, 0, 1, 1], [], []>} : vector<8x256xf32>, vector<256x128xf32>, vector<8x128xf32> -> vector<8x128xf32>
    %c0_9 = arith.constant 0 : index
    %c0_10 = arith.constant 0 : index
    %10 = vector.load %arg5[%c0_9, %c0_10] : memref<1x128xf32, #tpu.memory_space<vmem>>, vector<1x128xf32>
    %11 = vector.broadcast %10 : vector<1x128xf32> to vector<8x128xf32>
    %12 = arith.addf %9, %11 : vector<8x128xf32>
    %cst_11 = arith.constant dense<0xFF800000> : vector<8xf32>
    %13 = vector.multi_reduction <maximumf>, %12, %cst_11 [1] : vector<8x128xf32> to vector<8xf32>
    %14 = vector.shape_cast %13 : vector<8xf32> to vector<8x1xf32>
    %15 = vector.broadcast %14 : vector<8x1xf32> to vector<8x128xf32>
    %16 = arith.subf %12, %15 : vector<8x128xf32>
    %17 = math.exp %16 : vector<8x128xf32>
    %cst_12 = arith.constant dense<0.000000e+00> : vector<8xf32>
    %18 = vector.multi_reduction <add>, %17, %cst_12 [1] : vector<8x128xf32> to vector<8xf32>
    %19 = vector.shape_cast %18 : vector<8xf32> to vector<8x1xf32>
    %20 = vector.broadcast %19 : vector<8x1xf32> to vector<8x128xf32>
    %21 = arith.divf %17, %20 : vector<8x128xf32>
    %c0_13 = arith.constant 0 : index
    %c0_14 = arith.constant 0 : index
    %22 = vector.load %arg6[%c0_13, %c0_14] : memref<8x128xf32, #tpu.memory_space<vmem>>, vector<8x128xf32>
    %23 = arith.divf %17, %22 : vector<8x128xf32>
    %24 = tpu.iota {dimensions = array<i32: 1>} : vector<8x128xi32>
    %cst_15 = arith.constant dense<0xFF800000> : vector<8xf32>
    %25 = vector.multi_reduction <maximumf>, %23, %cst_15 [1] : vector<8x128xf32> to vector<8xf32>
    %26 = vector.shape_cast %25 : vector<8xf32> to vector<8x1xf32>
    %27 = vector.broadcast %26 : vector<8x1xf32> to vector<8x128xf32>
    %28 = arith.cmpf oge, %23, %27 : vector<8x128xf32>
    %c128_i32 = arith.constant 128 : i32
    %29 = vector.broadcast %c128_i32 : i32 to vector<8x128xi32>
    %30 = arith.select %28, %24, %29 : vector<8x128xi1>, vector<8x128xi32>
    %cst_16 = arith.constant dense<2147483647> : vector<8xi32>
    %31 = vector.multi_reduction <minsi>, %30, %cst_16 [1] : vector<8x128xi32> to vector<8xi32>
    %32 = vector.shape_cast %31 : vector<8xi32> to vector<8x1xi32>
    %33 = vector.broadcast %32 : vector<8x1xi32> to vector<8x128xi32>
    %34 = arith.cmpi eq, %24, %33 : vector<8x128xi32>
    %cst_17 = arith.constant 0.000000e+00 : f32
    %35 = vector.broadcast %cst_17 : f32 to vector<8x128xf32>
    %36 = arith.select %34, %12, %35 : vector<8x128xi1>, vector<8x128xf32>
    %cst_18 = arith.constant dense<0.000000e+00> : vector<8xf32>
    %37 = vector.multi_reduction <add>, %36, %cst_18 [1] : vector<8x128xf32> to vector<8xf32>
    %38 = vector.shape_cast %37 : vector<8xf32> to vector<8x1xf32>
    %39 = math.log %19 : vector<8x1xf32>
    %40 = arith.addf %14, %39 : vector<8x1xf32>
    %41 = arith.subf %38, %40 : vector<8x1xf32>
    %c126_i32 = arith.constant 126 : i32
    %42 = vector.broadcast %c126_i32 : i32 to vector<8x128xi32>
    %43 = arith.cmpi eq, %24, %42 : vector<8x128xi32>
    %44 = arith.sitofp %32 : vector<8x1xi32> to vector<8x1xf32>
    %45 = vector.shape_cast %44 : vector<8x1xf32> to vector<8x1xf32>
    %46 = vector.broadcast %45 : vector<8x1xf32> to vector<8x128xf32>
    %47 = arith.select %43, %46, %21 : vector<8x128xi1>, vector<8x128xf32>
    %c127_i32 = arith.constant 127 : i32
    %48 = vector.broadcast %c127_i32 : i32 to vector<8x128xi32>
    %49 = arith.cmpi eq, %24, %48 : vector<8x128xi32>
    %50 = vector.shape_cast %41 : vector<8x1xf32> to vector<8x1xf32>
    %51 = vector.broadcast %50 : vector<8x1xf32> to vector<8x128xf32>
    %52 = arith.select %49, %51, %47 : vector<8x128xi1>, vector<8x128xf32>
    %c0_19 = arith.constant 0 : index
    %c0_20 = arith.constant 0 : index
    %53 = vector.load %arg7[%c0_19, %c0_20] : memref<8x128xf32, #tpu.memory_space<vmem>>, vector<8x128xf32>
    tpu.vector_store %arg7[%c0_19, %c0_20], %52 {strides = array<i32>} : memref<8x128xf32, #tpu.memory_space<vmem>>, vector<8x128xf32>,
    return
  }
  func.func @transform_0(%arg0: i32) -> (i32, i32) {
    %c0_i32 = arith.constant 0 : i32
    %c0_i32_0 = arith.constant 0 : i32
    return %arg0, %c0_i32 : i32, i32
  }
  func.func @transform_1(%arg0: i32) -> (i32, i32) {
    %c0_i32 = arith.constant 0 : i32
    %c0_i32_0 = arith.constant 0 : i32
    %c0_i32_1 = arith.constant 0 : i32
    return %c0_i32, %c0_i32_0 : i32, i32
  }
  func.func @transform_2(%arg0: i32) -> (i32, i32) {
    %c0_i32 = arith.constant 0 : i32
    %c0_i32_0 = arith.constant 0 : i32
    %c0_i32_1 = arith.constant 0 : i32
    return %c0_i32, %c0_i32_0 : i32, i32
  }
  func.func @transform_3(%arg0: i32) -> (i32, i32) {
    %c0_i32 = arith.constant 0 : i32
    %c0_i32_0 = arith.constant 0 : i32
    %c0_i32_1 = arith.constant 0 : i32
    return %c0_i32, %c0_i32_0 : i32, i32
  }
  func.func @transform_4(%arg0: i32) -> (i32, i32) {
    %c0_i32 = arith.constant 0 : i32
    %c0_i32_0 = arith.constant 0 : i32
    %c0_i32_1 = arith.constant 0 : i32
    return %c0_i32, %c0_i32_0 : i32, i32
  }
  func.func @transform_5(%arg0: i32) -> (i32, i32) {
    %c0_i32 = arith.constant 0 : i32
    %c0_i32_0 = arith.constant 0 : i32
    return %arg0, %c0_i32 : i32, i32
  }
  func.func @transform_6(%arg0: i32) -> (i32, i32) {
    %c0_i32 = arith.constant 0 : i32
    %c0_i32_0 = arith.constant 0 : i32
    return %arg0, %c0_i32 : i32, i32
  }
}

</mosaic_0001>

<bundles_post_ra>
// kernel: policy_sample.1
= control target key start
LH: loop header
LB: loop body
LE: loop exit
PB: predicated region body
PF: predicated region fallthrough
CT: control target
= control target key end

     0   :  { %11 = vsyncpa [#allocation3], 0  ;;  %s297_s24 = smov [#allocation2]   ;;  %s298_s26 = smov 128   ;;  %s356_s0 = inlined_call_operand.vmem [shape: f32[8,4], index: 0, kind: input, shape index: {}]   ;;  %s357_s1 = inlined_call_operand.vmem [shape: f32[4,256], index: 1, kind: input, shape index: {}]   ;;  %s358_s2 = inlined_call_operand.vmem [shape: f32[1,256], index: 2, kind: input, shape index: {}]   ;;  %s359_s3 = inlined_call_operand.hbm [shape: f32[256,128], index: 3, kind: input, shape index: {}]   ;;  %s360_s4 = inlined_call_operand.vmem [shape: f32[1,128], index: 4, kind: input, shape index: {}]   ;;  %s361_s5 = inlined_call_operand.vmem [shape: f32[8,128], index: 5, kind: input, shape index: {}]   ;;  %s362_s6 = inlined_call_operand.vmem [shape: f32[8,128], index: 6, kind: output, shape index: {}]  }
   0x1   :  { %s22_s23 = sshll.u32 %s359_s3, 4  ;;  %s24_s25 = sshll.u32 %s297_s24, 4  ;;  %s23_s23 = int_to_ptr.hbm [resolvable:$true] %s22_s23  ;;  %s25_s25 = int_to_ptr.vmem [resolvable:$true] %s24_s25 }
   0x2   :  { %s299_s27 = smov 8  }
   0x3   :  { %30 = dma.hbm_to_vmem [thread:$0]  %s23_s23, 4096, %s25_s25, [#allocation3], %s298_s26, %s298_s26, %s299_s27  }
   0x4   :  { %295 = dma.done.wait [#allocation3], 4096  }
   0x5   :  { %296 = vsyncadd [#allocation3], 4294963200  ;;  %v40_v0 = vld [vmem:[%s357_s1] sm:$0xff]  ;;  %v116_v2 = vld [vmem:[#allocation2 + $0x70] sm:$0xff]  ;;  %vm55_vm0 = vcmask 1043456   ;;  %vm51_vm1 = vcmask 31744  }
   0x6   :  { %v117_v1 = vld [vmem:[#allocation2 + $0x78] sm:$0xff]  ;;  %48 = vst [vmem:[#allocation1] ss:$2 sm:$0xff] %v40_v0  ;;  %v115_v4 = vld [vmem:[#allocation2 + $0x68] sm:$0xff]  ;;  %v132_v5 = vld [vmem:[#allocation2 + $0xf0] sm:$0xff] }
   0x7   :  { %138 = vmatpush.msra.mxu2 %v117_v1  ;;  %v133_v3 = vld [vmem:[#allocation2 + $0xf8] sm:$0xff]  ;;  %v131_v6 = vld [vmem:[#allocation2 + $0xe8] sm:$0xff]  ;;  %v114_v7 = vld [vmem:[#allocation2 + $0x60] sm:$0xff] }
   0x8   :  { %158 = vmatpush.msra.mxu3 %v133_v3  ;;  %v130_v8 = vld [vmem:[#allocation2 + $0xe0] sm:$0xff]  ;;  %v39_v9 = vld [vmem:[%s356_s0] sm:$0xff]  ;;  %v112_v14 = vld [vmem:[#allocation2 + $0x50] sm:$0xff] }
   0x9   :  { %139 = vmatpush.msra.mxu2 %v116_v2  ;;  %v113_v10 = vld [vmem:[#allocation2 + $0x58] sm:$0xff]  ;;  %v128_v15 = vld [vmem:[#allocation2 + $0xd0] sm:$0xff]  ;;  %v111_v16 = vld [vmem:[#allocation2 + $0x48] sm:$0xff]  ;;  %v216_v2 = vlaneseq }
   0xa   :  { %159 = vmatpush.msra.mxu3 %v132_v5  ;;  %v129_v11 = vld [vmem:[#allocation2 + $0xd8] sm:$0xff]  ;;  %v127_v17 = vld [vmem:[#allocation2 + $0xc8] sm:$0xff]  ;;  %v110_v18 = vld [vmem:[#allocation2 + $0x40] sm:$0xff] }
   0xb   :  { %140 = vmatpush.msra.mxu2 %v115_v4  ;;  %v126_v19 = vld [vmem:[#allocation2 + $0xc0] sm:$0xff]  ;;  %v109_v20 = vld [vmem:[#allocation2 + $0x38] sm:$0xff]  ;;  %v108_v22 = vld [vmem:[#allocation2 + $0x30] sm:$0xff]  ;;  %v217_v3 = vand.u32 127, %v216_v2 }
   0xc   :  { %160 = vmatpush.msra.mxu3 %v131_v6  ;;  %v125_v21 = vld [vmem:[#allocation2 + $0xb8] sm:$0xff]  ;;  %v124_v23 = vld [vmem:[#allocation2 + $0xb0] sm:$0xff]  ;;  %v107_v24 = vld [vmem:[#allocation2 + $0x28] sm:$0xff] }
   0xd   :  { %141 = vmatpush.msra.mxu2 %v114_v7  ;;  %v49_v12 = vld.sshfl [vmem:[#allocation1] sm:$0xff pattern:$0x75316420]  ;;  %v50_v13 = vld.sshfl [vmem:[#allocation1 + $0x8] sm:$0xff pattern:$0x75316420] }
   0xe   :  { %161 = vmatpush.msra.mxu3 %v130_v8  ;;  %255 = vmatpush.msk.msra.mxu0 %vm55_vm0, %v49_v12  ;;  %v123_v25 = vld [vmem:[#allocation2 + $0xa8] sm:$0xff]  ;;  %v106_v26 = vld [vmem:[#allocation2 + $0x20] sm:$0xff]  ;;  %v105_v28 = vld [vmem:[#allocation2 + $0x18] sm:$0xff]  ;;  %vm244_vm13 = vcmp.eq.s32.totalorder %v217_v3, 126  ;;  %vm247_vm14 = vcmp.eq.s32.totalorder %v217_v3, 127 }
   0xf   :  { %257 = vmatpush.msk.msra.mxu1 %vm55_vm0, %v50_v13  ;;  %256 = vmatmul.msk.f32.vlgmr.msra.gmra.mxu0 %vm51_vm1, %v39_v9  ;;  %v122_v27 = vld [vmem:[#allocation2 + $0xa0] sm:$0xff]  ;;  %v104_v29 = vld [vmem:[#allocation2 + $0x10] sm:$0xff]  ;;  %v121_v30 = vld [vmem:[#allocation2 + $0x98] sm:$0xff] }
  0x10   :  { %258 = vmatmul.msk.f32.vlgmr.msra.gmra.mxu1 %vm51_vm1, %v39_v9  ;;  %142 = vmatpush.msra.mxu2 %v113_v10  ;;  %v103_v31 = vld [vmem:[#allocation2 + $0x8] sm:$0xff]  ;;  %v120_v32 = vld [vmem:[#allocation2 + $0x90] sm:$0xff]  ;;  %v102_v33 = vld [vmem:[#allocation2] sm:$0xff] }
  0x11   :  { %162 = vmatpush.msra.mxu3 %v129_v11  ;;  %v119_v34 = vld [vmem:[#allocation2 + $0x88] sm:$0xff]  ;;  %v118_v35 = vld [vmem:[#allocation2 + $0x80] sm:$0xff]  ;;  %v41_v36 = vld [vmem:[%s358_s2] sm:$0x3] }
  0x12   :  { %143 = vmatpush.msra.mxu2 %v112_v14  ;;  %v43_v37 = vperm.slane %v41_v36, 0  ;;  %v44_v38 = vperm.slane %v41_v36, 1  ;;  %v262_v45 = vld [vmem:[%s360_s4] ss:$0 sm:$0xff] }
  0x13   :  { %163 = vmatpush.msra.mxu3 %v128_v15  ;;  %v200_v50 = vld [vmem:[%s361_s5] sm:$0xff] }
  0x14   :  { %144 = vmatpush.msra.mxu2 %v111_v16  ;;  %263 = vrcp.f32 %v200_v50  ;;  %vm206_vm2 = vweird.f32 %v200_v50  ;;  %v212_v57 = vand.u32 2147483648, %v200_v50  ;;  %v210_v59 = vand.u32 2147483647, %v200_v50 }
  0x15   :  { %164 = vmatpush.msra.mxu3 %v127_v17 }
  0x16   :  { %145 = vmatpush.msra.mxu2 %v110_v18  ;;  %v213_v61 = vor.u32 1.1754944e-38, %v212_v57  ;;  %vm211_vm5 = vcmp.eq.f32.partialorder %v210_v59, 8.507059e+37 }
  0x17   :  { %165 = vmatpush.msra.mxu3 %v126_v19 }
  0x18   :  { %146 = vmatpush.msra.mxu2 %v109_v20 }
  0x19   :  { %166 = vmatpush.msra.mxu3 %v125_v21 }
  0x1a   :  { %147 = vmatpush.msra.mxu2 %v108_v22  ;;  %v264_v51 = vpop.eup %263 }
  0x1b   :  { %167 = vmatpush.msra.mxu3 %v124_v23  ;;  %v202_v52 = vmul.f32 %v264_v51, %v200_v50  ;;  %vm207_vm3 = vweird.f32 %v264_v51 }
  0x1c   :  { %148 = vmatpush.msra.mxu2 %v107_v24  ;;  %vm208_vm4 = vmor %vm206_vm2, %vm207_vm3 }
  0x1d   :  { %168 = vmatpush.msra.mxu3 %v123_v25  ;;  %v203_v53 = vsub.f32 1.0, %v202_v52 }
  0x1e   :  { %149 = vmatpush.msra.mxu2 %v106_v26 }
  0x1f   :  { %169 = vmatpush.msra.mxu3 %v122_v27  ;;  %v204_v54 = vmul.f32 %v264_v51, %v203_v53 }
  0x20   :  { %150 = vmatpush.msra.mxu2 %v105_v28 }
  0x21   :  { %170 = vmatpush.msra.mxu3 %v121_v30  ;;  %v205_v58 = vadd.f32 %v264_v51, %v204_v54 }
  0x22   :  { %151 = vmatpush.msra.mxu2 %v104_v29 }
  0x23   :  { %171 = vmatpush.msra.mxu3 %v120_v32  ;;  %v209_v62 = vsel %vm208_vm4, %v264_v51, %v205_v58 }
  0x24   :  { %152 = vmatpush.msra.mxu2 %v103_v31  ;;  %v214_v63 = vsel %vm211_vm5, %v213_v61, %v209_v62 }
  0x25   :  { %172 = vmatpush.msra.mxu3 %v119_v34 }
  0x26   :  { %153 = vmatpush.msra.mxu2 %v102_v33 }
  0x27   :  { %173 = vmatpush.msra.mxu3 %v118_v35 }
  0x8c   :  { %v77_v39 = vpop.f32.mrf.mxu0 }
  0x8d   :  { %v97_v40 = vpop.f32.mrf.mxu1  ;;  %v78_v41 = vadd.f32 %v77_v39, %v43_v37 }
  0x8e   :  { %v98_v42 = vadd.f32 %v97_v40, %v44_v38 }
  0x8f   :  { %v100_v43 = vmax.f32 %v78_v41, 0.0 }
  0x90   :  { %v101_v44 = vmax.f32 %v98_v42, 0.0 }
  0x91   :  { %154 = vmatmul.f32.vlgmr.msra.gmra.mxu2 %v100_v43 }
  0x92   :  { %174 = vmatmul.f32.vlgmr.msra.gmra.mxu3 %v101_v44 }
 0x114   :  { %v155_v46 = vpop.f32.mrf.mxu2 }
 0x115   :  { %v175_v47 = vpop.f32.mrf.mxu3  ;;  %v156_v48 = vadd.f32 %v262_v45, %v155_v46 }
 0x117   :  { %v176_v49 = vadd.f32 %v175_v47, %v156_v48 }
 0x119   :  { %178 = vmax.xlane.f32.xlu0 %v176_v49 }
 0x18c   :  { %v179_v55 = vpop.xlane.xlu0 %178 }
 0x18d   :  { %v180_v56 = vsub.f32 %v176_v49, %v179_v55 }
 0x18f   :  { %v181_v60 = vmul.f32 1.442695, %v180_v56 }
 0x191   :  { %265 = vpow2.f32 %v181_v60 }
 0x197   :  { %v266_v0 = vpop.eup %265 }
 0x198   :  { %183 = vadd.xlane.f32.xlu2 %v266_v0  ;;  %v215_v1 = vmul.f32 %v266_v0, %v214_v63 }
 0x19a   :  { %218 = vmax.xlane.f32.xlu0 %v215_v1 }
 0x20b   :  { %v184_v18 = vpop.xlane.xlu2 %183 }
 0x20c   :  { %267 = vrcp.f32 %v184_v18  ;;  %v196_v24 = vand.u32 2147483648, %v184_v18  ;;  %vm190_vm10 = vweird.f32 %v184_v18  ;;  %v194_v26 = vand.u32 2147483647, %v184_v18 }
 0x20d   :  { %v219_v4 = vpop.xlane.xlu0 %218  ;;  %269 = vlog2.f32 %v184_v18 }
 0x20e   :  { %vm220_vm6 = vcmp.ge.f32.partialorder %v215_v1, %v219_v4  ;;  %v197_v28 = vor.u32 1.1754944e-38, %v196_v24  ;;  %vm195_vm12 = vcmp.eq.f32.partialorder %v194_v26, 8.507059e+37 }
 0x20f   :  { %v221_v5 = vsel %vm220_vm6, %v217_v3, 128 }
 0x210   :  { %v223_v6 = vshra.s32 %v221_v5, 16  ;;  %v222_v8 = vand.u32 65535, %v221_v5 }
 0x212   :  { %v225_v7 = vcvt.s32.f32 %v223_v6  ;;  %v224_v10 = vcvt.s32.f32 %v222_v8  ;;  %v268_v19 = vpop.eup %267 }
 0x213   :  { %v186_v20 = vmul.f32 %v268_v19, %v184_v18  ;;  %vm191_vm9 = vweird.f32 %v268_v19  ;;  %v270_v25 = vpop.eup %269 }
 0x214   :  { %226 = vmin.xlane.f32.xlu1 %v225_v7  ;;  %vm192_vm11 = vmor %vm190_vm10, %vm191_vm9  ;;  %v241_v29 = vmul.f32 0.6931472, %v270_v25 }
 0x215   :  { %v187_v21 = vsub.f32 1.0, %v186_v20 }
 0x216   :  { %v242_v32 = vadd.f32 %v241_v29, %v179_v55 }
 0x217   :  { %v188_v22 = vmul.f32 %v268_v19, %v187_v21 }
 0x219   :  { %v189_v23 = vadd.f32 %v268_v19, %v188_v22 }
 0x21b   :  { %v193_v27 = vsel %vm192_vm11, %v268_v19, %v189_v23 }
 0x21c   :  { %v198_v30 = vsel %vm195_vm12, %v197_v28, %v193_v27 }
 0x21d   :  { %v199_v33 = vmul.f32 %v266_v0, %v198_v30 }
 0x287   :  { %v227_v9 = vpop.xlane.xlu1 %226 }
 0x288   :  { %vm228_vm7 = vcmp.eq.f32.partialorder %v225_v7, %v227_v9  ;;  %v233_v12 = vcvt.f32.s32 %v227_v9 }
 0x289   :  { %v229_v11 = vsel %vm228_vm7, %v224_v10, inf }
 0x28a   :  { %230 = vmin.xlane.f32.xlu1 %v229_v11  ;;  %v234_v14 = vshll.u32 %v233_v12, 16 }
 0x2fd   :  { %v231_v13 = vpop.xlane.xlu1 %230 }
 0x2fe   :  { %v232_v15 = vcvt.f32.s32 %v231_v13 }
 0x300   :  { %v235_v16 = vadd.s32 %v234_v14, %v232_v15 }
 0x302   :  { %vm236_vm8 = vcmp.eq.s32.totalorder %v217_v3, %v235_v16  ;;  %v245_v31 = vcvt.s32.f32 %v235_v16 }
 0x303   :  { %v237_v17 = vsel %vm236_vm8, %v176_v49, 0.0 }
 0x304   :  { %238 = vadd.xlane.f32.xlu2 %v237_v17  ;;  %v246_v36 = vsel %vm244_vm13, %v245_v31, %v199_v33 }
 0x377   :  { %v239_v34 = vpop.xlane.xlu2 %238 }
 0x378   :  { %v243_v35 = vsub.f32 %v239_v34, %v242_v32 }
 0x37a   :  { %v248_v37 = vsel %vm247_vm14, %v243_v35, %v246_v36 }
 0x37b   :  { %249 = vst [vmem:[%s362_s6] sm:$0xff] %v248_v37 }
 0x37c   :  { %254 = vsyncpa [#allocation3], 1 }

</bundles_post_ra>
